<compile_context>
chip_gen: v6e
topology: v6e:2x2x1
jax: 0.10.0
libtpu: 0.0.40
codegen_flags: <defaults>
</compile_context>

<pallas_src>
import functools

import jax
import jax.numpy as jnp
import numpy as np
from jax.experimental import pallas as pl
from jax.experimental.pallas import tpu as pltpu


# ---------------------------------------------------------------------------
# Pallas kernel: in-vreg mask factorization + 3x masked log-softmax NLL + label loop
# ---------------------------------------------------------------------------
def _conloss_kernel(sim_ref, cls_row_ref, cls_col_ref, cls_b_ref, sum_ref, mat_ref, *,
                    weights, eps, num_labels):
    """
    sim_ref     : (B, B, B)  similarity cube (any float dtype; cast to f32 in VMEM)
    cls_row_ref : (L, B)     class codes, row layout   -> c[k] slices (1, B)
    cls_col_ref : (B, L)     class codes, column layout-> c[j] slices (B, 1)
    cls_b_ref   : (B, L, 1)  class codes, batch layout -> c[b] slices (B, 1, 1)
    sum_ref     : (1, 1)     total weighted loss (summed over B^2, averaged over labels)
    mat_ref     : (B, B)     per-element weighted loss, row-major == torch .view(-1, B)
    """
    sim = sim_ref[...].astype(jnp.float32)          # (B, B, B) -- cast (if any) in VMEM
    B = sim.shape[0]

    # ---- label-independent part: ONE exp cube pass, three directional log-sum-exps ----
    gmax = jnp.max(sim, keepdims=True)              # (1, 1, 1) shared stable-softmax max
    e = jnp.exp(sim - gmax)                         # single transcendental cube pass
    g2 = gmax[0]                                    # (1, 1)
    lse_t = jnp.log(jnp.sum(e, axis=1)) + g2        # (B, B) indexed [b, k]  (loss_t)
    lse_v = jnp.log(jnp.sum(e, axis=2)) + g2        # (B, B) indexed [b, j]  (loss_v)
    lse_a = jnp.log(jnp.sum(e, axis=0)) + g2        # (B, B) indexed [j, k]  (loss_a)

    acc = jnp.zeros((B, B), jnp.float32)
    # num_labels is tiny & static (1 for mosi/mosei, `dim` for iemocap): unrolled loop;
    # all labels share the exp/lse work above and the single cube DMA.
    for l in range(num_labels):
        c_row = cls_row_ref[pl.ds(l, 1), :]         # (1, B)    c[k]
        c_col = cls_col_ref[:, pl.ds(l, 1)]         # (B, 1)    c[j]
        c_b = cls_b_ref[:, pl.ds(l, 1), :]          # (B, 1, 1) c[b]

        # Class-equality matrix (equivalence relation; class codes are never 0 by
        # construction, so the PyTorch mask factorizes as mask[b,j,k]=E[b,j]*E[b,k]).
        E = (c_col == c_row).astype(jnp.float32)    # (B, B)   E[x, y] = (c[x] == c[y])
        Eb = (c_b == c_row).astype(jnp.float32)     # (B, 1, B) = E[b, k] bcast over j

        n = jnp.sum(E, axis=1, keepdims=True)       # (B, 1) per-class counts
        M = E * n                                   # (B, B) shared sum(mask) for ALL dirs
        # exact reciprocal on purpose: approx=True would perturb the loss by ~1e-4 rel,
        # which changes the loss-function semantics for negligible gain at this size.
        inv = pl.reciprocal(jnp.maximum(M, eps), approx=False)

        # sum(sim*mask, ax) via the factorization -- 2 cube multiplies, 3 cube reductions
        wE = sim * E                                # E bcast as (1,B,B): sim[b,j,k]*E[j,k]
        s_t = jnp.sum(wE, axis=1)                   # (B, B) [b, k] = sum_j sim*E[j,k]
        s_v = jnp.sum(wE, axis=2)                   # (B, B) [b, j] = sum_k sim*E[j,k]
        w0 = sim * Eb                               # sim[b,j,k]*E[b,k]
        s_a = jnp.sum(w0, axis=0)                   # (B, B) [j, k] = sum_b sim*E[b,k]

        # -sum(log_softmax * mask) == lse * sum(mask) - sum(sim * mask)
        loss_t = (lse_t * M - E * s_t) * inv        # [b, k]
        loss_v = (lse_v * M - E * s_v) * inv        # [b, j]
        loss_a = (lse_a * M - E * s_a) * inv        # [j, k]
        acc = acc + (weights[0] * loss_t + weights[1] * loss_v + weights[2] * loss_a)

    acc = acc * jnp.float32(1.0 / num_labels)
    mat_ref[...] = acc
    sum_ref[...] = jnp.sum(acc, keepdims=True)      # finish the reduction in-kernel


def _conloss_pallas(similarity_cube, classes, weights, eps):
    """classes: (L, B) float32 class codes (one row per label column)."""
    B = similarity_cube.shape[0]
    L = classes.shape[0]

    cls_row = classes.astype(jnp.float32)           # (L, B)
    cls_col = jnp.transpose(cls_row)                # (B, L)
    cls_b = cls_col[:, :, None]                     # (B, L, 1)

    kernel = functools.partial(
        _conloss_kernel,
        weights=tuple(float(w) for w in weights),
        eps=float(eps),
        num_labels=int(L),
    )
    # Explicit VMEM budget: f32 cube + a few cube-sized temporaries + slack, capped so it
    # is valid on v7x (64 MiB physical) as well as v5e/v6e.
    vmem_limit = int(min(64 * 2**20, max(16 * 2**20, 8 * 4 * B**3)))

    loss_sum, loss_mat = pl.pallas_call(
        kernel,
        out_shape=(jax.ShapeDtypeStruct((1, 1), jnp.float32),    # in-kernel reduction
                   jax.ShapeDtypeStruct((B, B), jnp.float32)),   # reduction='none' path
        # single step: full-array blocks, no grid, no pipelining/double-buffering needed.
        in_specs=[
            pl.BlockSpec((B, B, B), lambda: (0, 0, 0)),
            pl.BlockSpec((L, B), lambda: (0, 0)),
            pl.BlockSpec((B, L), lambda: (0, 0)),
            pl.BlockSpec((B, L, 1), lambda: (0, 0, 0)),
        ],
        out_specs=(
            pl.BlockSpec((1, 1), lambda: (0, 0)),
            pl.BlockSpec((B, B), lambda: (0, 0)),
        ),
        compiler_params=pltpu.CompilerParams(vmem_limit_bytes=vmem_limit),
    )(similarity_cube, cls_row, cls_col, cls_b)
    return loss_sum, loss_mat


# ---------------------------------------------------------------------------
# Public wrapper (matches the PyTorch ConLoss.forward semantics)
# ---------------------------------------------------------------------------
def con_loss(similarity_cube, target, dataset, reduction="mean",
             weights=(1.0, 1.0, 1.0)):
    assert dataset in ("mosi", "mosei", "iemocap"), "dataset must be mosi/mosei/iemocap"
    B, dim = target.shape
    eps = 1e-6

    if dataset in ("mosi", "mosei"):
        cls = jnp.round(target[:, 0].astype(jnp.float32))
        cls = jnp.where(cls >= 0, 3.0, -3.0)
        classes = cls[None, :]                       # (1, B)
    else:  # iemocap: all `dim` label columns handled inside ONE kernel launch
        cls = target.astype(jnp.float32)
        cls = jnp.where(cls == 0, 10.0, cls)
        classes = jnp.transpose(cls)                 # (dim, B)

    loss_sum, loss_mat = _conloss_pallas(similarity_cube, classes, weights, eps)
    total = loss_sum[0, 0]

    if reduction == "sum":
        return total / B
    if reduction == "mean":
        return total / (B * B)
    return loss_mat.reshape(B * B)


# ---------------------------------------------------------------------------
# Pure-JAX reference (mirrors the PyTorch code) for the correctness check
# ---------------------------------------------------------------------------
def _ref_get_mask_cube(classes, B):
    c = classes.reshape(B).astype(jnp.float32)
    c_b = c[:, None, None]
    c_j = c[None, :, None]
    c_k = c[None, None, :]
    inter = jnp.where(c_j == c_k, c_j, 0.0)
    return (inter == c_b).astype(jnp.float32)


def _ref_contrastive_loss(sim, mask, weights, eps=1e-6):
    B = sim.shape[0]

    def row_loss(logit, m):
        ls = jax.nn.log_softmax(logit, axis=-1)
        return -jnp.sum(ls * m, axis=-1) / jnp.maximum(jnp.sum(m, axis=-1), eps)

    logit_t = jnp.transpose(sim, (0, 2, 1)).reshape(-1, B)
    mask_t = jnp.transpose(mask, (0, 2, 1)).reshape(-1, B)
    logit_v = sim.reshape(-1, B)
    mask_v = mask.reshape(-1, B)
    logit_a = jnp.transpose(sim, (1, 2, 0)).reshape(-1, B)
    mask_a = jnp.transpose(mask, (1, 2, 0)).reshape(-1, B)
    return (weights[0] * row_loss(logit_t, mask_t)
            + weights[1] * row_loss(logit_v, mask_v)
            + weights[2] * row_loss(logit_a, mask_a))


def _ref_con_loss(sim, target, dataset, reduction="mean", weights=(1.0, 1.0, 1.0)):
    B, dim = target.shape
    if dataset in ("mosi", "mosei"):
        cls = jnp.where(jnp.round(target[:, 0]) >= 0, 3.0, -3.0)
        loss = _ref_contrastive_loss(sim, _ref_get_mask_cube(cls, B), weights)
    else:
        loss = jnp.zeros((B * B,), jnp.float32)
        for idx in range(dim):
            cls = jnp.where(target[:, idx] == 0, 10.0, target[:, idx])
            loss = loss + _ref_contrastive_loss(sim, _ref_get_mask_cube(cls, B), weights)
        loss = loss / dim
    if reduction == "sum":
        return jnp.sum(loss) / B
    if reduction == "mean":
        return jnp.mean(loss)
    return loss


# ---------------------------------------------------------------------------
if __name__ == "__main__":
    key = jax.random.PRNGKey(0)
    B = 8

    k1, k2, k3 = jax.random.split(key, 3)
    similarity_cube = jax.random.normal(k1, (B, B, B), dtype=jnp.float32)
    # mosi/mosei-style regression targets in [-3, 3], shape (B, 1)
    target_mosi = jax.random.uniform(k2, (B, 1), minval=-3.0, maxval=3.0,
                                     dtype=jnp.float32)
    # iemocap-style multi-label targets in {0, 1}, shape (B, 4)
    target_iemo = (jax.random.uniform(k3, (B, 4)) > 0.5).astype(jnp.float32)

    # mosi, reduction='mean'
    out = jax.block_until_ready(con_loss(similarity_cube, target_mosi, "mosi", "mean"))
    ref = _ref_con_loss(similarity_cube, target_mosi, "mosi", "mean")
    np.testing.assert_allclose(np.asarray(out), np.asarray(ref), rtol=1e-4, atol=1e-4)

    # mosi, reduction='none' (raw (B^2,) loss vector -> checks per-element ordering)
    out = jax.block_until_ready(con_loss(similarity_cube, target_mosi, "mosi", "none"))
    ref = _ref_con_loss(similarity_cube, target_mosi, "mosi", "none")
    np.testing.assert_allclose(np.asarray(out), np.asarray(ref), rtol=1e-4, atol=1e-4)

    # iemocap, reduction='mean'  (all 4 label columns fused into a single kernel launch)
    out = jax.block_until_ready(con_loss(similarity_cube, target_iemo, "iemocap", "mean"))
    ref = _ref_con_loss(similarity_cube, target_iemo, "iemocap", "mean")
    np.testing.assert_allclose(np.asarray(out), np.asarray(ref), rtol=1e-4, atol=1e-4)

    # iemocap, reduction='sum'
    out = jax.block_until_ready(con_loss(similarity_cube, target_iemo, "iemocap", "sum"))
    ref = _ref_con_loss(similarity_cube, target_iemo, "iemocap", "sum")
    np.testing.assert_allclose(np.asarray(out), np.asarray(ref), rtol=1e-4, atol=1e-4)

    # bf16 similarity cube (cast-to-f32 happens inside VMEM; halves the only real HBM DMA)
    sim_bf16 = similarity_cube.astype(jnp.bfloat16)
    out = jax.block_until_ready(con_loss(sim_bf16, target_mosi, "mosi", "mean"))
    ref = _ref_con_loss(sim_bf16.astype(jnp.float32), target_mosi, "mosi", "mean")
    np.testing.assert_allclose(np.asarray(out), np.asarray(ref), rtol=1e-4, atol=1e-4)

    print("KERNEL_OK")
</pallas_src>

<mosaic_0001>
module attributes {stable_mosaic.version = 11 : i64} {
  func.func @_conloss_kernel(%arg0: memref<8x8x8xf32, #tpu.memory_space<vmem>>, %arg1: memref<1x8xf32, #tpu.memory_space<vmem>>, %arg2: memref<8x1xf32, #tpu.memory_space<vmem>>, %arg3: memref<8x1x1xf32, #tpu.memory_space<vmem>>, %arg4: memref<1x1xf32, #tpu.memory_space<vmem>>, %arg5: memref<8x8xf32, #tpu.memory_space<vmem>>) attributes {dimension_semantics = [], scalar_prefetch = 0 : i64, scratch_operands = 0 : i64, tpu.core_type = #tpu.core_type<tc>} {
    %c0 = arith.constant 0 : index
    %c0_0 = arith.constant 0 : index
    %c0_1 = arith.constant 0 : index
    %0 = vector.load %arg0[%c0, %c0_0, %c0_1] : memref<8x8x8xf32, #tpu.memory_space<vmem>>, vector<8x8x8xf32>
    %1 = vector.shape_cast %0 : vector<8x8x8xf32> to vector<1x8x8x8xf32>
    %cst = arith.constant dense<0xFF800000> : vector<1xf32>
    %2 = vector.multi_reduction <maximumf>, %1, %cst [1, 2, 3] : vector<1x8x8x8xf32> to vector<1xf32>
    %3 = vector.shape_cast %2 : vector<1xf32> to vector<1x1x1x1xf32>
    %4 = vector.extract %3[0, 0, 0, 0] : f32 from vector<1x1x1x1xf32>
    %5 = vector.broadcast %4 : f32 to vector<1x1x1xf32>
    %6 = vector.broadcast %5 : vector<1x1x1xf32> to vector<8x8x8xf32>
    %7 = arith.subf %0, %6 : vector<8x8x8xf32>
    %8 = math.exp %7 : vector<8x8x8xf32>
    %9 = vector.shape_cast %5 : vector<1x1x1xf32> to vector<1x1xf32>
    %cst_2 = arith.constant dense<0.000000e+00> : vector<8x8xf32>
    %10 = vector.multi_reduction <add>, %8, %cst_2 [1] : vector<8x8x8xf32> to vector<8x8xf32>
    %11 = math.log %10 : vector<8x8xf32>
    %12 = vector.broadcast %9 : vector<1x1xf32> to vector<8x8xf32>
    %13 = arith.addf %11, %12 : vector<8x8xf32>
    %cst_3 = arith.constant dense<0.000000e+00> : vector<8x8xf32>
    %14 = vector.multi_reduction <add>, %8, %cst_3 [2] : vector<8x8x8xf32> to vector<8x8xf32>
    %15 = math.log %14 : vector<8x8xf32>
    %16 = vector.broadcast %9 : vector<1x1xf32> to vector<8x8xf32>
    %17 = arith.addf %15, %16 : vector<8x8xf32>
    %cst_4 = arith.constant dense<0.000000e+00> : vector<8x8xf32>
    %18 = vector.multi_reduction <add>, %8, %cst_4 [0] : vector<8x8x8xf32> to vector<8x8xf32>
    %19 = math.log %18 : vector<8x8xf32>
    %20 = vector.broadcast %9 : vector<1x1xf32> to vector<8x8xf32>
    %21 = arith.addf %19, %20 : vector<8x8xf32>
    %cst_5 = arith.constant 0.000000e+00 : f32
    %22 = vector.broadcast %cst_5 : f32 to vector<8x8xf32>
    %c0_6 = arith.constant 0 : index
    %c0_7 = arith.constant 0 : index
    %23 = vector.load %arg1[%c0_6, %c0_7] : memref<1x8xf32, #tpu.memory_space<vmem>>, vector<1x8xf32>
    %c0_8 = arith.constant 0 : index
    %c0_9 = arith.constant 0 : index
    %24 = vector.load %arg2[%c0_8, %c0_9] : memref<8x1xf32, #tpu.memory_space<vmem>>, vector<8x1xf32>
    %c0_10 = arith.constant 0 : index
    %c0_11 = arith.constant 0 : index
    %c0_12 = arith.constant 0 : index
    %25 = vector.load %arg3[%c0_10, %c0_11, %c0_12] : memref<8x1x1xf32, #tpu.memory_space<vmem>>, vector<8x1x1xf32>
    %26 = vector.broadcast %24 : vector<8x1xf32> to vector<8x8xf32>
    %27 = vector.broadcast %23 : vector<1x8xf32> to vector<8x8xf32>
    %28 = arith.cmpf oeq, %26, %27 : vector<8x8xf32>
    %29 = arith.extui %28 : vector<8x8xi1> to vector<8x8xi32>
    %30 = arith.sitofp %29 : vector<8x8xi32> to vector<8x8xf32>
    %31 = vector.shape_cast %23 : vector<1x8xf32> to vector<1x1x8xf32>
    %32 = vector.broadcast %25 : vector<8x1x1xf32> to vector<8x1x8xf32>
    %33 = vector.broadcast %31 : vector<1x1x8xf32> to vector<8x1x8xf32>
    %34 = arith.cmpf oeq, %32, %33 : vector<8x1x8xf32>
    %35 = arith.extui %34 : vector<8x1x8xi1> to vector<8x1x8xi32>
    %36 = arith.sitofp %35 : vector<8x1x8xi32> to vector<8x1x8xf32>
    %cst_13 = arith.constant dense<0.000000e+00> : vector<8xf32>
    %37 = vector.multi_reduction <add>, %30, %cst_13 [1] : vector<8x8xf32> to vector<8xf32>
    %38 = vector.shape_cast %37 : vector<8xf32> to vector<8x1xf32>
    %39 = vector.broadcast %38 : vector<8x1xf32> to vector<8x8xf32>
    %40 = arith.mulf %30, %39 : vector<8x8xf32>
    %cst_14 = arith.constant 9.99999997E-7 : f32
    %41 = vector.broadcast %cst_14 : f32 to vector<8x8xf32>
    %42 = arith.maximumf %40, %41 : vector<8x8xf32>
    %43 = tpu.reciprocal %42 : vector<8x8xf32> -> vector<8x8xf32>
    %44 = vector.shape_cast %30 : vector<8x8xf32> to vector<1x8x8xf32>
    %45 = vector.broadcast %44 : vector<1x8x8xf32> to vector<8x8x8xf32>
    %46 = arith.mulf %0, %45 : vector<8x8x8xf32>
    %cst_15 = arith.constant dense<0.000000e+00> : vector<8x8xf32>
    %47 = vector.multi_reduction <add>, %46, %cst_15 [1] : vector<8x8x8xf32> to vector<8x8xf32>
    %cst_16 = arith.constant dense<0.000000e+00> : vector<8x8xf32>
    %48 = vector.multi_reduction <add>, %46, %cst_16 [2] : vector<8x8x8xf32> to vector<8x8xf32>
    %49 = vector.broadcast %36 : vector<8x1x8xf32> to vector<8x8x8xf32>
    %50 = arith.mulf %0, %49 : vector<8x8x8xf32>
    %cst_17 = arith.constant dense<0.000000e+00> : vector<8x8xf32>
    %51 = vector.multi_reduction <add>, %50, %cst_17 [0] : vector<8x8x8xf32> to vector<8x8xf32>
    %52 = arith.mulf %13, %40 : vector<8x8xf32>
    %53 = arith.mulf %30, %47 : vector<8x8xf32>
    %54 = arith.subf %52, %53 : vector<8x8xf32>
    %55 = arith.mulf %54, %43 : vector<8x8xf32>
    %56 = arith.mulf %17, %40 : vector<8x8xf32>
    %57 = arith.mulf %30, %48 : vector<8x8xf32>
    %58 = arith.subf %56, %57 : vector<8x8xf32>
    %59 = arith.mulf %58, %43 : vector<8x8xf32>
    %60 = arith.mulf %21, %40 : vector<8x8xf32>
    %61 = arith.mulf %30, %51 : vector<8x8xf32>
    %62 = arith.subf %60, %61 : vector<8x8xf32>
    %63 = arith.mulf %62, %43 : vector<8x8xf32>
    %cst_18 = arith.constant 1.000000e+00 : f32
    %64 = vector.broadcast %cst_18 : f32 to vector<8x8xf32>
    %65 = arith.mulf %64, %55 : vector<8x8xf32>
    %cst_19 = arith.constant 1.000000e+00 : f32
    %66 = vector.broadcast %cst_19 : f32 to vector<8x8xf32>
    %67 = arith.mulf %66, %59 : vector<8x8xf32>
    %68 = arith.addf %65, %67 : vector<8x8xf32>
    %cst_20 = arith.constant 1.000000e+00 : f32
    %69 = vector.broadcast %cst_20 : f32 to vector<8x8xf32>
    %70 = arith.mulf %69, %63 : vector<8x8xf32>
    %71 = arith.addf %68, %70 : vector<8x8xf32>
    %72 = arith.addf %22, %71 : vector<8x8xf32>
    %cst_21 = arith.constant 1.000000e+00 : f32
    %73 = vector.broadcast %cst_21 : f32 to vector<8x8xf32>
    %74 = arith.mulf %72, %73 : vector<8x8xf32>
    %c0_22 = arith.constant 0 : index
    %c0_23 = arith.constant 0 : index
    %75 = vector.load %arg5[%c0_22, %c0_23] : memref<8x8xf32, #tpu.memory_space<vmem>>, vector<8x8xf32>
    tpu.vector_store %arg5[%c0_22, %c0_23], %74 {strides = array<i32>} : memref<8x8xf32, #tpu.memory_space<vmem>>, vector<8x8xf32>,
    %76 = vector.shape_cast %74 : vector<8x8xf32> to vector<1x8x8xf32>
    %cst_24 = arith.constant dense<0.000000e+00> : vector<1xf32>
    %77 = vector.multi_reduction <add>, %76, %cst_24 [1, 2] : vector<1x8x8xf32> to vector<1xf32>
    %78 = vector.shape_cast %77 : vector<1xf32> to vector<1x1x1xf32>
    %79 = vector.extract %78[0, 0, 0] : f32 from vector<1x1x1xf32>
    %80 = vector.broadcast %79 : f32 to vector<1x1xf32>
    %c0_25 = arith.constant 0 : index
    %c0_26 = arith.constant 0 : index
    %81 = vector.load %arg4[%c0_25, %c0_26] : memref<1x1xf32, #tpu.memory_space<vmem>>, vector<1x1xf32>
    tpu.vector_store %arg4[%c0_25, %c0_26], %80 {strides = array<i32>} : memref<1x1xf32, #tpu.memory_space<vmem>>, vector<1x1xf32>,
    return
  }
}

</mosaic_0001>

<bundles_post_ra>
// kernel: tpu_custom_call.1
= control target key start
LH: loop header
LB: loop body
LE: loop exit
PB: predicated region body
PF: predicated region fallthrough
CT: control target
= control target key end

     0   :  { %11 = vsyncpa [#allocation3], 0  ;;  %s1615_s0 = inlined_call_operand.hbm [shape: f32[8,8,8], index: 0, kind: input, shape index: {}]   ;;  %s1616_s1 = inlined_call_operand.vmem [shape: f32[1,8], index: 1, kind: input, shape index: {}]   ;;  %s1617_s2 = inlined_call_operand.vmem [shape: f32[8,1], index: 2, kind: input, shape index: {}]   ;;  %s1618_s3 = inlined_call_operand.vmem [shape: f32[8,1,1], index: 3, kind: input, shape index: {}]   ;;  %s1619_s4 = inlined_call_operand.hbm [shape: f32[1,1], index: 4, kind: output, shape index: {0}]   ;;  %s1620_s5 = inlined_call_operand.hbm [shape: f32[8,8], index: 5, kind: output, shape index: {1}]  }
   0x1   :  { %12 = vsyncpa [#allocation4], 0 }
   0x2   :  { %13 = vsyncpa [#allocation7], 0  ;;  %s1195_s18 = smov [#allocation2]  }
   0x3   :  { %s19_s19 = sshll.u32 %s1195_s18, 4  ;;  %s20_s19 = int_to_ptr.vmem [resolvable:$true] %s19_s19 }
   0x4   :  { %s1137_s20 = scalar_lea.vmem %s20_s19, 1024  ;;  %p1142_p1 = scmp.lt.s32.totalorder %s20_s19, %s20_s19 }
   0x5   :  { %p1138_p0 = scmp.ne.s32.totalorder %s20_s19, %s1137_s20  ;;  %p1143_p2 = scmp.lt.s32.totalorder %s1137_s20, %s1137_s20 }
   0x7   :  { %p1144_p3 = por %p1143_p2, %p1142_p1 }
   0x9   :  { %p1145_p4 = pnand %p1144_p3, %p1138_p0 }
   0xb   :  { %1148 = shalt.err (!%p1145_p4)
}
   0xc   :  { %s1196_s21 = smov 128   ;;  %s1197_s22 = smov 8  }
   0xd   :  { %25 = dma.hbm_to_vmem [thread:$0]  %s1615_s0, 1024, %s20_s19, [#allocation3], %s1196_s21, %s1196_s21, %s1197_s22  }
   0xe   :  { %1189 = dma.done.wait [#allocation3], 1024  }
   0xf   :  { %1190 = vsyncadd [#allocation3], 4294966272  ;;  %v1198_v0 = vmov 0   ;;  %vm43_vm0 = vcmask 64512   ;;  %v1235_v1 = vld [vmem:[#allocation2] sm:$0xff]  ;;  %v1237_v2 = vld [vmem:[#allocation2 + $0x8] sm:$0xff]  ;;  %v239_v25 = vlaneseq }
  0x10   :  { %1066 = vset.pattern.permute.xlu0 %v1198_v0  ;;  %1067 = vset.pattern.permute.xlu1 %v1198_v0  ;;  %v1239_v3 = vld [vmem:[#allocation2 + $0x10] sm:$0xff]  ;;  %v1241_v4 = vld [vmem:[#allocation2 + $0x18] sm:$0xff]  ;;  %v1243_v5 = vld [vmem:[#allocation2 + $0x20] sm:$0xff]  ;;  %v44_v7 = vsel %vm43_vm0, %v1235_v1, -inf  ;;  %v45_v8 = vsel %vm43_vm0, %v1237_v2, -inf  ;;  %v1199_v37 = vmov 0.0  }
  0x11   :  { %v1245_v6 = vld [vmem:[#allocation2 + $0x28] sm:$0xff]  ;;  %v46_v9 = vsel %vm43_vm0, %v1239_v3, -inf  ;;  %v1253_v10 = vld [vmem:[#allocation2 + $0x30] sm:$0xff]  ;;  %v1255_v11 = vld [vmem:[#allocation2 + $0x38] sm:$0xff]  ;;  %v47_v12 = vsel %vm43_vm0, %v1241_v4, -inf  ;;  %v48_v13 = vsel %vm43_vm0, %v1243_v5, -inf }
  0x12   :  { %v50_v14 = vsel %vm43_vm0, %v1245_v6, -inf  ;;  %v49_v15 = vmax.f32 %v44_v7, %v48_v13  ;;  %v52_v17 = vsel %vm43_vm0, %v1253_v10, -inf  ;;  %v54_v18 = vsel %vm43_vm0, %v1255_v11, -inf  ;;  %v224_v24 = vld [vmem:[%s1617_s2] sm:$0xff] }
  0x13   :  { %v51_v16 = vmax.f32 %v45_v8, %v50_v14  ;;  %v53_v19 = vmax.f32 %v46_v9, %v52_v17  ;;  %v55_v20 = vmax.f32 %v47_v12, %v54_v18  ;;  %v1271_v26 = vshrl.u32 %v239_v25, 7  ;;  %v1279_v30 = vld [vmem:[%s1616_s1] sm:$0x1] }
  0x14   :  { %vm532_vm2 = vcmask 1041409   ;;  %vm534_vm3 = vcmask 1042434   ;;  %vm536_vm4 = vcmask 1043459   ;;  %vm538_vm5 = vcmask 1044484  }
  0x15   :  { %v56_v21 = vmax.f32 %v49_v15, %v51_v16  ;;  %v57_v22 = vmax.f32 %v53_v19, %v55_v20  ;;  %v1274_v29 = vsub.s32 0, %v1271_v26  ;;  %vm540_vm6 = vcmask 1045509  }
  0x16   :  { %vm542_vm7 = vcmask 1046534   ;;  %vm544_vm8 = vcmask 1047559  }
  0x17   :  { %v58_v23 = vmax.f32 %v56_v21, %v57_v22  ;;  %v242_v33 = vrot.slane %v1279_v30, %v1274_v29 }
  0x19   :  { %59 = vmax.xlane.f32.xlu0 %v58_v23 }
  0x2f   :  { %235 = vperm.xlu0 %1066, %v224_v24  }
  0xa2   :  { %v60_v27 = vpop.xlane.xlu0 %59 }
  0xa3   :  { %v61_v28 = vrot.slane %v60_v27, 4 }
  0xa5   :  { %v62_v31 = vmax.f32 %v60_v27, %v61_v28 }
  0xa7   :  { %v63_v32 = vrot.slane %v62_v31, 2 }
  0xa9   :  { %v64_v34 = vmax.f32 %v62_v31, %v63_v32 }
  0xaa   :  { %v236_v35 = vpop.permute.xlu0 %235 }
  0xab   :  { %vm244_vm1 = vcmp.eq.f32.partialorder %v236_v35, %v242_v33  ;;  %v65_v36 = vrot.slane %v64_v34, 1 }
  0xac   :  { %v1284_v38 = vsel %vm244_vm1, 1.0, %v1199_v37 }
  0xad   :  { %v343_v39 = vsel %vm43_vm0, %v1284_v38, 0.0  ;;  %v66_v40 = vmax.f32 %v64_v34, %v65_v36  ;;  %v349_v41 = vmul.f32 %v1284_v38, %v1235_v1  ;;  %v350_v42 = vmul.f32 %v1284_v38, %v1237_v2 }
  0xae   :  { %344 = vadd.xlane.f32.xlu1 %v343_v39  ;;  %v351_v43 = vmul.f32 %v1284_v38, %v1239_v3  ;;  %v352_v44 = vmul.f32 %v1284_v38, %v1241_v4  ;;  %v353_v45 = vmul.f32 %v1284_v38, %v1243_v5  ;;  %v354_v46 = vmul.f32 %v1284_v38, %v1245_v6 }
  0xaf   :  { %1055 = vpush %v66_v40  ;;  %v357_v47 = vsel %vm43_vm0, %v349_v41, 0.0  ;;  %v364_v48 = vsel %vm43_vm0, %v350_v42, 0.0  ;;  %v355_v49 = vmul.f32 %v1284_v38, %v1253_v10  ;;  %v356_v50 = vmul.f32 %v1284_v38, %v1255_v11 }
  0xb0   :  { %v358_v51 = vrot.slane %v357_v47, 4  ;;  %v365_v52 = vrot.slane %v364_v48, 4  ;;  %v371_v53 = vsel %vm43_vm0, %v351_v43, 0.0  ;;  %v378_v54 = vsel %vm43_vm0, %v352_v44, 0.0 }
  0xb1   :  { %v372_v55 = vrot.slane %v371_v53, 4  ;;  %v379_v56 = vrot.slane %v378_v54, 4  ;;  %v1309_v57 = vsel %vm43_vm0, %v353_v45, 0.0  ;;  %v1312_v58 = vsel %vm43_vm0, %v354_v46, 0.0 }
  0xb2   :  { %v359_v59 = vadd.f32 %v358_v51, %v357_v47  ;;  %413 = vadd.xlane.f32.xlu1 %v357_v47  ;;  %v366_v60 = vadd.f32 %v365_v52, %v364_v48  ;;  %v386_v61 = vrot.slane %v1309_v57, 4  ;;  %v393_v62 = vrot.slane %v1312_v58, 4 }
  0xb3   :  { %v373_v63 = vadd.f32 %v372_v55, %v371_v53  ;;  %v380_v0 = vadd.f32 %v379_v56, %v378_v54  ;;  %v399_v7 = vsel %vm43_vm0, %v355_v49, 0.0  ;;  %v406_v8 = vsel %vm43_vm0, %v356_v50, 0.0 }
  0xb4   :  { %v360_v9 = vrot.slane %v359_v59, 2  ;;  %v367_v12 = vrot.slane %v366_v60, 2  ;;  %v387_v13 = vadd.f32 %v386_v61, %v1309_v57  ;;  %v394_v14 = vadd.f32 %v393_v62, %v1312_v58 }
  0xb5   :  { %v374_v15 = vrot.slane %v373_v63, 2  ;;  %v381_v16 = vrot.slane %v380_v0, 2  ;;  %v400_v17 = vrot.slane %v399_v7, 4  ;;  %v407_v18 = vrot.slane %v406_v8, 4 }
  0xb6   :  { %v361_v19 = vadd.f32 %v360_v9, %v359_v59  ;;  %v368_v20 = vadd.f32 %v367_v12, %v366_v60  ;;  %415 = vadd.xlane.f32.xlu1 %v364_v48  ;;  %v388_v21 = vrot.slane %v387_v13, 2  ;;  %v395_v22 = vrot.slane %v394_v14, 2 }
  0xb7   :  { %v375_v23 = vadd.f32 %v374_v15, %v373_v63  ;;  %v382_v24 = vadd.f32 %v381_v16, %v380_v0  ;;  %v401_v27 = vadd.f32 %v400_v17, %v399_v7  ;;  %v408_v28 = vadd.f32 %v407_v18, %v406_v8 }
  0xb8   :  { %v362_v31 = vrot.slane %v361_v19, 1  ;;  %v369_v32 = vrot.slane %v368_v20, 1  ;;  %v389_v33 = vadd.f32 %v388_v21, %v387_v13  ;;  %v396_v34 = vadd.f32 %v395_v22, %v394_v14 }
  0xb9   :  { %v376_v35 = vrot.slane %v375_v23, 1  ;;  %v383_v36 = vrot.slane %v382_v24, 1  ;;  %v402_v39 = vrot.slane %v401_v27, 2  ;;  %v409_v40 = vrot.slane %v408_v28, 2 }
  0xba   :  { %v363_v41 = vadd.f32 %v362_v31, %v361_v19  ;;  %v370_v42 = vadd.f32 %v369_v32, %v368_v20  ;;  %417 = vadd.xlane.f32.xlu1 %v371_v53  ;;  %v390_v43 = vrot.slane %v389_v33, 1  ;;  %v397_v45 = vrot.slane %v396_v34, 1 }
  0xbb   :  { %v377_v44 = vadd.f32 %v376_v35, %v375_v23  ;;  %v403_v46 = vadd.f32 %v402_v39, %v401_v27  ;;  %v410_v47 = vadd.f32 %v409_v40, %v408_v28  ;;  %v384_v48 = vadd.f32 %v383_v36, %v382_v24 }
  0xbc   :  { %v533_v51 = vsel %vm532_vm2, %v370_v42, %v363_v41  ;;  %v391_v52 = vadd.f32 %v390_v43, %v389_v33  ;;  %v398_v56 = vadd.f32 %v397_v45, %v396_v34 }
  0xbd   :  { %v404_v49 = vrot.slane %v403_v46, 1  ;;  %v411_v50 = vrot.slane %v410_v47, 1  ;;  %v535_v55 = vsel %vm534_vm3, %v377_v44, %v533_v51 }
  0xbe   :  { %419 = vadd.xlane.f32.xlu1 %v378_v54  ;;  %v537_v53 = vsel %vm536_vm4, %v384_v48, %v535_v55 }
  0xbf   :  { %v405_v59 = vadd.f32 %v404_v49, %v403_v46  ;;  %v539_v60 = vsel %vm538_vm5, %v391_v52, %v537_v53  ;;  %v412_v61 = vadd.f32 %v411_v50, %v410_v47 }
  0xc0   :  { %v541_v62 = vsel %vm540_vm6, %v398_v56, %v539_v60 }
  0xc1   :  { %v543_v63 = vsel %vm542_vm7, %v405_v59, %v541_v62 }
  0xc2   :  { %421 = vadd.xlane.f32.xlu1 %v1309_v57  ;;  %v1328_v54 = vsel %vm544_vm8, %v412_v61, %v543_v63 }
  0xc6   :  { %423 = vadd.xlane.f32.xlu1 %v1312_v58 }
  0xca   :  { %425 = vadd.xlane.f32.xlu1 %v399_v7 }
  0xce   :  { %427 = vadd.xlane.f32.xlu1 %v406_v8 }
  0xe0   :  { %s1056_s2 = spop %1055 }
  0xe1   :  { %v1331_v0 = vstv %s1056_s2 }
  0xe2   :  { %v72_v9 = vsub.f32 %v1241_v4, %v1331_v0  ;;  %v70_v12 = vsub.f32 %v1237_v2, %v1331_v0  ;;  %v71_v57 = vsub.f32 %v1239_v3, %v1331_v0  ;;  %v69_v13 = vsub.f32 %v1235_v1, %v1331_v0 }
  0xe3   :  { %v73_v8 = vsub.f32 %v1243_v5, %v1331_v0  ;;  %v74_v4 = vsub.f32 %v1245_v6, %v1331_v0  ;;  %v75_v3 = vsub.f32 %v1253_v10, %v1331_v0  ;;  %v76_v1 = vsub.f32 %v1255_v11, %v1331_v0 }
  0xe4   :  { %v83_v14 = vmul.f32 1.442695, %v72_v9  ;;  %v79_v15 = vmul.f32 1.442695, %v70_v12  ;;  %v81_v58 = vmul.f32 1.442695, %v71_v57 }
  0xe5   :  { %v77_v7 = vmul.f32 1.442695, %v69_v13  ;;  %v85_v2 = vmul.f32 1.442695, %v73_v8  ;;  %v87_v16 = vmul.f32 1.442695, %v74_v4 }
  0xe6   :  { %1068 = vpow2.f32 %v83_v14  ;;  %v89_v17 = vmul.f32 1.442695, %v75_v3  ;;  %v91_v18 = vmul.f32 1.442695, %v76_v1 }
  0xe7   :  { %1070 = vpow2.f32 %v79_v15 }
  0xe8   :  { %1072 = vpow2.f32 %v81_v58 }
  0xe9   :  { %1074 = vpow2.f32 %v77_v7 }
  0xea   :  { %1076 = vpow2.f32 %v85_v2 }
  0xeb   :  { %1078 = vpow2.f32 %v87_v16 }
  0xec   :  { %1080 = vpow2.f32 %v89_v17 }
  0xed   :  { %1082 = vpow2.f32 %v91_v18 }
  0xf3   :  { %v1069_v5 = vpop.eup %1068 }
  0xf4   :  { %v1071_v19 = vpop.eup %1070  ;;  %v114_v6 = vsel %vm43_vm0, %v1069_v5, 0.0 }
  0xf5   :  { %v1073_v20 = vpop.eup %1072  ;;  %179 = vadd.xlane.f32.xlu0 %v114_v6  ;;  %v100_v21 = vsel %vm43_vm0, %v1071_v19, 0.0  ;;  %v115_v44 = vrot.slane %v114_v6, 4 }
  0xf6   :  { %v1075_v22 = vpop.eup %1074  ;;  %175 = vadd.xlane.f32.xlu1 %v100_v21  ;;  %v107_v11 = vsel %vm43_vm0, %v1073_v20, 0.0  ;;  %v101_v45 = vrot.slane %v100_v21, 4 }
  0xf7   :  { %v93_v10 = vsel %vm43_vm0, %v1075_v22, 0.0  ;;  %v1077_v24 = vpop.eup %1076  ;;  %v108_v46 = vrot.slane %v107_v11, 4  ;;  %v116_v48 = vadd.f32 %v115_v44, %v114_v6 }
  0xf8   :  { %v213_v23 = vadd.f32 %v100_v21, %v93_v10  ;;  %v1079_v28 = vpop.eup %1078  ;;  %v121_v32 = vsel %vm43_vm0, %v1077_v24, 0.0  ;;  %v94_v47 = vrot.slane %v93_v10, 4  ;;  %v102_v50 = vadd.f32 %v101_v45, %v100_v21 }
  0xf9   :  { %v1081_v33 = vpop.eup %1080  ;;  %v128_v35 = vsel %vm43_vm0, %v1079_v28, 0.0  ;;  %v122_v49 = vrot.slane %v121_v32, 4  ;;  %v109_v52 = vadd.f32 %v108_v46, %v107_v11  ;;  %v117_v53 = vrot.slane %v116_v48, 2 }
  0xfa   :  { %177 = vadd.xlane.f32.xlu1 %v107_v11  ;;  %v214_v27 = vadd.f32 %v213_v23, %v107_v11  ;;  %v1083_v36 = vpop.eup %1082  ;;  %v135_v40 = vsel %vm43_vm0, %v1081_v33, 0.0  ;;  %v129_v51 = vrot.slane %v128_v35, 4  ;;  %v95_v55 = vadd.f32 %v94_v47, %v93_v10 }
  0xfb   :  { %v142_v42 = vsel %vm43_vm0, %v1083_v36, 0.0  ;;  %v136_v56 = vrot.slane %v135_v40, 4  ;;  %v123_v59 = vadd.f32 %v122_v49, %v121_v32  ;;  %v103_v61 = vrot.slane %v102_v50, 2 }
  0xfc   :  { %v215_v31 = vadd.f32 %v214_v27, %v114_v6  ;;  %v143_v60 = vrot.slane %v142_v42, 4  ;;  %v130_v62 = vadd.f32 %v129_v51, %v128_v35  ;;  %v110_v63 = vrot.slane %v109_v52, 2 }
  0xfd   :  { %v96_v9 = vrot.slane %v95_v55, 2  ;;  %v137_v12 = vadd.f32 %v136_v56, %v135_v40  ;;  %v118_v57 = vadd.f32 %v117_v53, %v116_v48  ;;  %v124_v13 = vrot.slane %v123_v59, 2 }
  0xfe   :  { %173 = vadd.xlane.f32.xlu1 %v93_v10  ;;  %v216_v34 = vadd.f32 %v215_v31, %v121_v32  ;;  %v144_v14 = vadd.f32 %v143_v60, %v142_v42  ;;  %v104_v15 = vadd.f32 %v103_v61, %v102_v50  ;;  %v131_v58 = vrot.slane %v130_v62, 2 }
  0xff   :  { %v111_v7 = vadd.f32 %v110_v63, %v109_v52  ;;  %v97_v8 = vadd.f32 %v96_v9, %v95_v55  ;;  %v138_v4 = vrot.slane %v137_v12, 2  ;;  %v119_v2 = vrot.slane %v118_v57, 1 }
 0x100   :  { %v217_v39 = vadd.f32 %v216_v34, %v128_v35  ;;  %v125_v3 = vadd.f32 %v124_v13, %v123_v59  ;;  %v145_v16 = vrot.slane %v144_v14, 2  ;;  %v105_v1 = vrot.slane %v104_v15, 1 }
 0x101   :  { %v132_v17 = vadd.f32 %v131_v58, %v130_v62  ;;  %v112_v18 = vrot.slane %v111_v7, 1  ;;  %v98_v5 = vrot.slane %v97_v8, 1  ;;  %v139_v19 = vadd.f32 %v138_v4, %v137_v12 }
 0x102   :  { %181 = vadd.xlane.f32.xlu1 %v121_v32  ;;  %v218_v41 = vadd.f32 %v217_v39, %v135_v40  ;;  %v120_v6 = vadd.f32 %v119_v2, %v118_v57  ;;  %v126_v20 = vrot.slane %v125_v3, 1  ;;  %v146_v21 = vadd.f32 %v145_v16, %v144_v14 }
 0x103   :  { %v106_v22 = vadd.f32 %v105_v1, %v104_v15  ;;  %v133_v10 = vrot.slane %v132_v17, 1  ;;  %v113_v23 = vadd.f32 %v112_v18, %v111_v7  ;;  %v99_v11 = vadd.f32 %v98_v5, %v97_v8 }
 0x104   :  { %v219_v43 = vadd.f32 %v218_v41, %v142_v42  ;;  %v140_v24 = vrot.slane %v139_v19, 1  ;;  %1084 = vlog2.f32 %v120_v6  ;;  %v127_v27 = vadd.f32 %v126_v20, %v125_v3 }
 0x105   :  { %v147_v28 = vrot.slane %v146_v21, 1  ;;  %1086 = vlog2.f32 %v106_v22  ;;  %v134_v31 = vadd.f32 %v133_v10, %v132_v17  ;;  %v1359_v41 = vmul.f32 %v1284_v38, %v1328_v54 }
 0x106   :  { %183 = vadd.xlane.f32.xlu1 %v128_v35  ;;  %1088 = vlog2.f32 %v113_v23  ;;  %v141_v32 = vadd.f32 %v140_v24, %v139_v19  ;;  %v1362_v46 = vsub.s32 2, %v1271_v26  ;;  %v1365_v47 = vsub.s32 1, %v1271_v26 }
 0x107   :  { %1090 = vlog2.f32 %v99_v11  ;;  %v148_v33 = vadd.f32 %v147_v28, %v146_v21  ;;  %v1371_v49 = vsub.s32 6, %v1271_v26  ;;  %v1374_v50 = vsub.s32 3, %v1271_v26 }
 0x108   :  { %1092 = vlog2.f32 %v127_v27  ;;  %v550_v54 = vrot.slane %v1359_v41, 2  ;;  %v551_v51 = vrot.slane %v1359_v41, 3  ;;  %v1382_v57 = vsub.s32 4, %v1271_v26 }
 0x109   :  { %1094 = vlog2.f32 %v134_v31  ;;  %v553_v13 = vrot.slane %v1359_v41, 5  ;;  %v549_v14 = vrot.slane %v1359_v41, 1  ;;  %v555_v8 = vrot.slane %v1359_v41, 7 }
 0x10a   :  { %185 = vadd.xlane.f32.xlu1 %v135_v40  ;;  %1096 = vlog2.f32 %v219_v43  ;;  %v1368_v43 = vsub.s32 5, %v1271_v26  ;;  %v552_v22 = vrot.slane %v1359_v41, 4 }
 0x10b   :  { %1098 = vlog2.f32 %v141_v32 }
 0x10c   :  { %1100 = vlog2.f32 %v148_v33 }
 0x10e   :  { %187 = vadd.xlane.f32.xlu1 %v142_v42 }
 0x111   :  { %v1085_v34 = vpop.eup %1084 }
 0x112   :  { %v1087_v35 = vpop.eup %1086  ;;  %v156_v55 = vmul.f32 0.6931472, %v1085_v34 }
 0x113   :  { %v1089_v36 = vpop.eup %1088  ;;  %v152_v56 = vmul.f32 0.6931472, %v1087_v35 }
 0x114   :  { %v1091_v39 = vpop.eup %1090  ;;  %v154_v52 = vmul.f32 0.6931472, %v1089_v36  ;;  %v168_v58 = vadd.f32 %v156_v55, %v1331_v0 }
 0x115   :  { %v1093_v40 = vpop.eup %1092  ;;  %v150_v59 = vmul.f32 0.6931472, %v1091_v39  ;;  %v166_v7 = vadd.f32 %v152_v56, %v1331_v0 }
 0x116   :  { %v1095_v42 = vpop.eup %1094  ;;  %v158_v60 = vmul.f32 0.6931472, %v1093_v40  ;;  %v167_v15 = vadd.f32 %v154_v52, %v1331_v0 }
 0x117   :  { %v1097_v44 = vpop.eup %1096  ;;  %v160_v62 = vmul.f32 0.6931472, %v1095_v42  ;;  %v165_v16 = vadd.f32 %v150_v59, %v1331_v0 }
 0x118   :  { %v1099_v45 = vpop.eup %1098  ;;  %v221_v53 = vmul.f32 0.6931472, %v1097_v44  ;;  %v169_v5 = vadd.f32 %v158_v60, %v1331_v0 }
 0x119   :  { %v1101_v48 = vpop.eup %1100  ;;  %v162_v9 = vmul.f32 0.6931472, %v1099_v45  ;;  %v170_v17 = vadd.f32 %v160_v62, %v1331_v0  ;;  %v554_v45 = vrot.slane %v1359_v41, 6 }
 0x11a   :  { %v164_v63 = vmul.f32 0.6931472, %v1101_v48  ;;  %v222_v4 = vadd.f32 %v221_v53, %v1331_v0 }
 0x11b   :  { %v171_v19 = vadd.f32 %v162_v9, %v1331_v0  ;;  %v647_v9 = vsub.s32 7, %v1271_v26 }
 0x11c   :  { %v172_v18 = vadd.f32 %v164_v63, %v1331_v0 }
 0x137   :  { %v345_v61 = vpop.xlane.xlu1 %344 }
 0x138   :  { %v1379_v12 = vmul.f32 %v1284_v38, %v345_v61 }
 0x13a   :  { %v613_v2 = vrot.slane %v1379_v12, %v1362_v46  ;;  %v606_v3 = vrot.slane %v1379_v12, %v1365_v47  ;;  %v634_v6 = vrot.slane %v1379_v12, %v1368_v43  ;;  %v599_v20 = vrot.slane %v1379_v12, %v1274_v29 }
 0x13b   :  { %v414_v1 = vpop.xlane.xlu1 %413  ;;  %v1405_v21 = vmul.f32 %v1379_v12, %v222_v4  ;;  %v502_v10 = vrot.slane %v1379_v12, 2  ;;  %v503_v23 = vrot.slane %v1379_v12, 3  ;;  %v505_v11 = vrot.slane %v1379_v12, 5 }
 0x13c   :  { %615 = vbcast.lane.b32.xlu0 %v613_v2, 256  ;;  %608 = vbcast.lane.b32.xlu1 %v606_v3, 256  ;;  %v501_v24 = vrot.slane %v1379_v12, 1  ;;  %v507_v27 = vrot.slane %v1379_v12, 7  ;;  %v1414_v28 = vmul.f32 %v1379_v12, %v165_v16  ;;  %v504_v31 = vrot.slane %v1379_v12, 4 }
 0x13d   :  { %v506_v32 = vrot.slane %v1379_v12, 6  ;;  %v518_v34 = vmul.f32 %v502_v10, %v167_v15  ;;  %v519_v35 = vmul.f32 %v503_v23, %v168_v58  ;;  %v521_v36 = vmul.f32 %v505_v11, %v170_v17 }
 0x13e   :  { %v517_v39 = vmul.f32 %v501_v24, %v166_v7  ;;  %v641_v40 = vrot.slane %v1379_v12, %v1371_v49  ;;  %v523_v42 = vmul.f32 %v507_v27, %v172_v18  ;;  %v564_v44 = vsub.f32 %v1414_v28, %v1359_v41 }
 0x13f   :  { %v416_v33 = vpop.xlane.xlu1 %415  ;;  %v1423_v48 = vsub.f32 %v518_v34, %v550_v54  ;;  %v1425_v52 = vsub.f32 %v519_v35, %v551_v51  ;;  %v1427_v55 = vsub.f32 %v521_v36, %v553_v13  ;;  %v620_v53 = vrot.slane %v1379_v12, %v1374_v50 }
 0x140   :  { %636 = vbcast.lane.b32.xlu0 %v634_v6, 256  ;;  %601 = vbcast.lane.b32.xlu1 %v599_v20, 256  ;;  %v1429_v56 = vsub.f32 %v517_v39, %v549_v14  ;;  %v1433_v59 = vsub.f32 %v523_v42, %v555_v8  ;;  %v520_v60 = vmul.f32 %v504_v31, %v169_v5  ;;  %v677_v14 = vand.u32 127, %v239_v25 }
 0x141   :  { %v522_v61 = vmul.f32 %v506_v32, %v171_v19  ;;  %v627_v51 = vrot.slane %v1379_v12, %v1382_v57  ;;  %v648_v15 = vrot.slane %v1379_v12, %v647_v9  ;;  %v347_v2 = vmax.f32 %v1379_v12, 1e-06 }
 0x142   :  { %v1435_v63 = vsub.f32 %v520_v60, %v552_v22  ;;  %v1445_v7 = vsub.s32 %v677_v14, %v1271_v26  ;;  %v231_v14 = vld [vmem:[%s1618_s3 + $0x6] sm:$0x1] }
 0x143   :  { %v418_v62 = vpop.xlane.xlu1 %417  ;;  %v1437_v54 = vsub.f32 %v522_v61, %v554_v45  ;;  %1102 = vrcp.f32 %v347_v2 }
 0x144   :  { %643 = vbcast.lane.b32.xlu0 %v641_v40, 256  ;;  %622 = vbcast.lane.b32.xlu1 %v620_v53, 256  ;;  %v685_v4 = vrot.slane %v416_v33, %v1445_v7  ;;  %v689_v3 = vrot.slane %v418_v62, %v1445_v7  ;;  %v681_v16 = vrot.slane %v414_v1, %v1445_v7 }
 0x146   :  { %v710_v5 = vsel %vm532_vm2, %v685_v4, %v681_v16 }
 0x147   :  { %v420_v13 = vpop.xlane.xlu1 %419  ;;  %v711_v26 = vsel %vm534_vm3, %v689_v3, %v710_v5 }
 0x148   :  { %629 = vbcast.lane.b32.xlu1 %v627_v51, 256  ;;  %v693_v17 = vrot.slane %v420_v13, %v1445_v7  ;;  %v225_v51 = vld [vmem:[%s1618_s3] sm:$0x1]  ;;  %v229_v13 = vld [vmem:[%s1618_s3 + $0x4] sm:$0x1] }
 0x14a   :  { %v712_v12 = vsel %vm536_vm4, %v693_v17, %v711_v26 }
 0x14b   :  { %v422_v58 = vpop.xlane.xlu1 %421 }
 0x14c   :  { %650 = vbcast.lane.b32.xlu1 %v648_v15, 256  ;;  %v697_v25 = vrot.slane %v422_v58, %v1445_v7 }
 0x14e   :  { %v713_v20 = vsel %vm538_vm5, %v697_v25, %v712_v12 }
 0x14f   :  { %v424_v8 = vpop.xlane.xlu1 %423 }
 0x150   :  { %v701_v19 = vrot.slane %v424_v8, %v1445_v7  ;;  %v1468_v34 = vpop.eup %1102 }
 0x151   :  { %v809_v35 = vrot.slane %v1468_v34, %v1362_v46  ;;  %v816_v39 = vrot.slane %v1468_v34, %v1374_v50  ;;  %v823_v42 = vrot.slane %v1468_v34, %v1382_v57  ;;  %v844_v60 = vrot.slane %v1468_v34, %v647_v9 }
 0x152   :  { %v714_v1 = vsel %vm540_vm6, %v701_v19, %v713_v20  ;;  %v795_v61 = vrot.slane %v1468_v34, %v1274_v29  ;;  %v837_v62 = vrot.slane %v1468_v34, %v1371_v49 }
 0x153   :  { %v426_v18 = vpop.xlane.xlu1 %425 }
 0x154   :  { %v705_v6 = vrot.slane %v426_v18, %v1445_v7 }
 0x156   :  { %v715_v23 = vsel %vm542_vm7, %v705_v6, %v714_v1 }
 0x157   :  { %v428_v22 = vpop.xlane.xlu1 %427 }
 0x158   :  { %v709_v10 = vrot.slane %v428_v22, %v1445_v7 }
 0x15a   :  { %v716_v11 = vsel %vm544_vm8, %v709_v10, %v715_v23 }
 0x15b   :  { %v718_v24 = vmul.f32 %v1284_v38, %v716_v11 }
 0x15d   :  { %v744_v27 = vrot.slane %v718_v24, %v1374_v50  ;;  %v730_v31 = vrot.slane %v718_v24, %v1365_v47  ;;  %v758_v32 = vrot.slane %v718_v24, %v1368_v43  ;;  %v737_v33 = vrot.slane %v718_v24, %v1362_v46 }
 0x15e   :  { %v723_v36 = vrot.slane %v718_v24, %v1274_v29  ;;  %v751_v40 = vrot.slane %v718_v24, %v1382_v57  ;;  %v765_v45 = vrot.slane %v718_v24, %v1371_v49  ;;  %v830_v46 = vrot.slane %v1468_v34, %v1368_v43  ;;  %v226_v57 = vld [vmem:[%s1618_s3 + $0x1] sm:$0x1]  ;;  %v228_v43 = vld [vmem:[%s1618_s3 + $0x3] sm:$0x1]  ;;  %v227_v49 = vld [vmem:[%s1618_s3 + $0x2] sm:$0x1] }
 0x15f   :  { %746 = vbcast.lane.b32.xlu0 %v744_v27, 256  ;;  %732 = vbcast.lane.b32.xlu1 %v730_v31, 256  ;;  %v772_v53 = vrot.slane %v718_v24, %v647_v9  ;;  %v802_v50 = vrot.slane %v1468_v34, %v1365_v47  ;;  %v230_v47 = vld [vmem:[%s1618_s3 + $0x5] sm:$0x1]  ;;  %v232_v9 = vld [vmem:[%s1618_s3 + $0x7] sm:$0x1] }
 0x163   :  { %760 = vbcast.lane.b32.xlu0 %v758_v32, 256  ;;  %739 = vbcast.lane.b32.xlu1 %v737_v33, 256 }
 0x167   :  { %811 = vbcast.lane.b32.xlu0 %v809_v35, 256  ;;  %725 = vbcast.lane.b32.xlu1 %v723_v36, 256 }
 0x16b   :  { %818 = vbcast.lane.b32.xlu0 %v816_v39, 256  ;;  %753 = vbcast.lane.b32.xlu1 %v751_v40, 256 }
 0x16f   :  { %825 = vbcast.lane.b32.xlu0 %v823_v42, 256  ;;  %767 = vbcast.lane.b32.xlu1 %v765_v45, 256 }
 0x173   :  { %832 = vbcast.lane.b32.xlu0 %v830_v46, 256  ;;  %774 = vbcast.lane.b32.xlu1 %v772_v53, 256 }
 0x177   :  { %846 = vbcast.lane.b32.xlu0 %v844_v60, 256  ;;  %804 = vbcast.lane.b32.xlu1 %v802_v50, 256 }
 0x17b   :  { %258 = vperm.xlu0 %1066, %v226_v57   ;;  %797 = vbcast.lane.b32.xlu1 %v795_v61, 256 }
 0x17e   :  { %v180_v18 = vpop.xlane.xlu0 %179 }
 0x17f   :  { %276 = vperm.xlu0 %1066, %v228_v43   ;;  %839 = vbcast.lane.b32.xlu1 %v837_v62, 256  ;;  %v176_v15 = vpop.xlane.xlu1 %175 }
 0x183   :  { %294 = vperm.xlu0 %1066, %v230_v47   ;;  %249 = vperm.xlu1 %1067, %v225_v51   ;;  %v178_v58 = vpop.xlane.xlu1 %177 }
 0x184   :  { %1104 = vlog2.f32 %v178_v58 }
 0x185   :  { %1106 = vlog2.f32 %v180_v18 }
 0x187   :  { %312 = vperm.xlu0 %1066, %v232_v9   ;;  %267 = vperm.xlu1 %1067, %v227_v49   ;;  %v174_v8 = vpop.xlane.xlu1 %173 }
 0x18b   :  { %285 = vperm.xlu1 %1067, %v229_v13   ;;  %v182_v4 = vpop.xlane.xlu1 %181 }
 0x18f   :  { %303 = vperm.xlu1 %1067, %v231_v14   ;;  %v184_v2 = vpop.xlane.xlu1 %183 }
 0x190   :  { %1108 = vlog2.f32 %v184_v2 }
 0x191   :  { %v1105_v12 = vpop.eup %1104  ;;  %1110 = vlog2.f32 %v176_v15 }
 0x192   :  { %v194_v1 = vmul.f32 0.6931472, %v1105_v12  ;;  %v1107_v10 = vpop.eup %1106 }
 0x193   :  { %v186_v3 = vpop.xlane.xlu1 %185  ;;  %v196_v24 = vmul.f32 0.6931472, %v1107_v10 }
 0x194   :  { %v207_v27 = vadd.f32 %v194_v1, %v1331_v0 }
 0x195   :  { %v208_v35 = vadd.f32 %v196_v24, %v1331_v0 }
 0x197   :  { %v188_v16 = vpop.xlane.xlu1 %187 }
 0x198   :  { %1112 = vlog2.f32 %v188_v16 }
 0x199   :  { %1114 = vlog2.f32 %v174_v8 }
 0x19a   :  { %1116 = vlog2.f32 %v182_v4 }
 0x19b   :  { %1118 = vlog2.f32 %v186_v3 }
 0x19d   :  { %v1109_v39 = vpop.eup %1108 }
 0x19e   :  { %v1111_v53 = vpop.eup %1110  ;;  %v200_v60 = vmul.f32 0.6931472, %v1109_v39 }
 0x19f   :  { %v192_v47 = vmul.f32 0.6931472, %v1111_v53 }
 0x1a0   :  { %v210_v9 = vadd.f32 %v200_v60, %v1331_v0 }
 0x1a1   :  { %v206_v8 = vadd.f32 %v192_v47, %v1331_v0 }
 0x1a5   :  { %v1113_v57 = vpop.eup %1112 }
 0x1a6   :  { %v204_v51 = vmul.f32 0.6931472, %v1113_v57  ;;  %v1115_v49 = vpop.eup %1114 }
 0x1a7   :  { %v190_v58 = vmul.f32 0.6931472, %v1115_v49  ;;  %v1117_v3 = vpop.eup %1116 }
 0x1a8   :  { %v212_v4 = vadd.f32 %v204_v51, %v1331_v0  ;;  %v198_v1 = vmul.f32 0.6931472, %v1117_v3 }
 0x1a9   :  { %v205_v10 = vadd.f32 %v190_v58, %v1331_v0 }
 0x1aa   :  { %v209_v39 = vadd.f32 %v198_v1, %v1331_v0  ;;  %v1122_v1 = vld [vmem:[#allocation2 + $0x10] sm:$0xff] }
 0x1ae   :  { %v609_v17 = vpop.permute.xlu1 %608  ;;  %v616_v5 = vpop.permute.xlu0 %615 }
 0x1af   :  { %v662_v33 = vmul.f32 %v616_v5, %v207_v27  ;;  %v661_v5 = vmul.f32 %v609_v17, %v206_v8  ;;  %v1119_v27 = vpop.eup %1118 }
 0x1b2   :  { %v1512_v25 = vpop.permute.xlu1 %601  ;;  %v637_v26 = vpop.permute.xlu0 %636 }
 0x1b3   :  { %v665_v15 = vmul.f32 %v637_v26, %v210_v9 }
 0x1b6   :  { %v623_v19 = vpop.permute.xlu1 %622  ;;  %v1516_v20 = vpop.permute.xlu0 %643 }
 0x1b7   :  { %v663_v45 = vmul.f32 %v623_v19, %v208_v35 }
 0x1ba   :  { %v1514_v6 = vpop.permute.xlu1 %629 }
 0x1be   :  { %v651_v22 = vpop.permute.xlu1 %650 }
 0x1bf   :  { %v667_v19 = vmul.f32 %v651_v22, %v212_v4  ;;  %v664_v22 = vmul.f32 %v1514_v6, %v209_v39  ;;  %v1123_v39 = vld [vmem:[#allocation2 + $0x18] sm:$0xff] }
 0x1d1   :  { %v733_v23 = vpop.permute.xlu1 %732  ;;  %v747_v11 = vpop.permute.xlu0 %746 }
 0x1d2   :  { %v787_v50 = vsub.f32 %v663_v45, %v747_v11  ;;  %v785_v11 = vsub.f32 %v661_v5, %v733_v23  ;;  %v1121_v5 = vld [vmem:[#allocation2 + $0x8] sm:$0xff] }
 0x1d5   :  { %v740_v31 = vpop.permute.xlu1 %739  ;;  %v761_v32 = vpop.permute.xlu0 %760 }
 0x1d6   :  { %v786_v36 = vsub.f32 %v662_v33, %v740_v31  ;;  %v789_v2 = vsub.f32 %v665_v15, %v761_v32  ;;  %v660_v33 = vmul.f32 %v1512_v25, %v205_v10  ;;  %v202_v32 = vmul.f32 0.6931472, %v1119_v27 }
 0x1d8   :  { %v211_v23 = vadd.f32 %v202_v32, %v1331_v0 }
 0x1d9   :  { %v726_v40 = vpop.permute.xlu1 %725  ;;  %v812_v42 = vpop.permute.xlu0 %811 }
 0x1da   :  { %v858_v46 = vmul.f32 %v812_v42, %v786_v36  ;;  %v784_v42 = vsub.f32 %v660_v33, %v726_v40  ;;  %v666_v53 = vmul.f32 %v1516_v20, %v211_v23  ;;  %v1124_v23 = vld [vmem:[#allocation2 + $0x20] sm:$0xff] }
 0x1dc   :  { %883 = vperm.xlu0 %1066, %v858_v46  }
 0x1dd   :  { %v754_v61 = vpop.permute.xlu1 %753  ;;  %v819_v43 = vpop.permute.xlu0 %818 }
 0x1de   :  { %v859_v62 = vmul.f32 %v819_v43, %v787_v50  ;;  %v788_v46 = vsub.f32 %v664_v22, %v754_v61 }
 0x1e0   :  { %886 = vperm.xlu0 %1066, %v859_v62  }
 0x1e1   :  { %v768_v13 = vpop.permute.xlu1 %767  ;;  %v826_v14 = vpop.permute.xlu0 %825 }
 0x1e2   :  { %v860_v60 = vmul.f32 %v826_v14, %v788_v46  ;;  %v790_v50 = vsub.f32 %v666_v53, %v768_v13 }
 0x1e5   :  { %v775_v16 = vpop.permute.xlu1 %774  ;;  %v833_v18 = vpop.permute.xlu0 %832 }
 0x1e6   :  { %v861_v12 = vmul.f32 %v833_v18, %v789_v2  ;;  %v791_v24 = vsub.f32 %v667_v19, %v775_v16  ;;  %v1120_v2 = vld [vmem:[#allocation2] sm:$0xff] }
 0x1e8   :  { %892 = vperm.xlu0 %1066, %v861_v12  }
 0x1e9   :  { %v805_v26 = vpop.permute.xlu1 %804  ;;  %v847_v31 = vpop.permute.xlu0 %846 }
 0x1ea   :  { %v857_v35 = vmul.f32 %v805_v26, %v785_v11  ;;  %v863_v36 = vmul.f32 %v847_v31, %v791_v24 }
 0x1ec   :  { %880 = vperm.xlu1 %1067, %v857_v35   ;;  %898 = vperm.xlu0 %1066, %v863_v36  }
 0x1ed   :  { %v798_v17 = vpop.permute.xlu1 %797 }
 0x1ee   :  { %v856_v45 = vmul.f32 %v798_v17, %v784_v42 }
 0x1f0   :  { %877 = vperm.xlu1 %1067, %v856_v45  }
 0x1f1   :  { %v840_v25 = vpop.permute.xlu1 %839 }
 0x1f2   :  { %v862_v57 = vmul.f32 %v840_v25, %v790_v50 }
 0x1f4   :  { %889 = vperm.xlu1 %1067, %v860_v60  }
 0x1f6   :  { %v259_v40 = vpop.permute.xlu0 %258 }
 0x1f7   :  { %v264_v6 = vrot.slane %v259_v40, %v1274_v29  ;;  %v1126_v40 = vld [vmem:[#allocation2 + $0x28] sm:$0xff] }
 0x1f8   :  { %895 = vperm.xlu1 %1067, %v862_v57   ;;  %v1125_v57 = vld [vmem:[%s1616_s1] sm:$0x1]  ;;  %s1200_s1 = smov [#allocation6]  }
 0x1f9   :  { %vm320_vm10 = vcmp.eq.f32.partialorder %v264_v6, %v1279_v30  ;;  %s1033_s20 = sshll.u32 %s1200_s1, 4  ;;  %s1034_s20 = int_to_ptr.vmem [resolvable:$true] %s1033_s20 }
 0x1fa   :  { %v277_v0 = vpop.permute.xlu0 %276  ;;  %v1048_v49 = vsel %vm320_vm10, 1.0, %v1199_v37  ;;  %s1149_s21 = scalar_lea.vmem %s1034_s20, 128  ;;  %p1154_p6 = scmp.lt.s32.totalorder %s1034_s20, %s1034_s20 }
 0x1fb   :  { %v282_v9 = vrot.slane %v277_v0, %v1274_v29  ;;  %v444_v58 = vrot.slane %v1048_v49, %v1274_v29  ;;  %p1150_p5 = scmp.ne.s32.totalorder %s1034_s20, %s1149_s21  ;;  %p1155_p7 = scmp.lt.s32.totalorder %s1149_s21, %s1149_s21 }
 0x1fd   :  { %vm322_vm12 = vcmp.eq.f32.partialorder %v282_v9, %v1279_v30  ;;  %v478_v19 = vmul.f32 %v1121_v5, %v444_v58  ;;  %v575_v5 = vrot.slane %v1468_v34, 3  ;;  %p1156_p8 = por %p1155_p7, %p1154_p6 }
 0x1fe   :  { %v250_v43 = vpop.permute.xlu1 %249  ;;  %v295_v4 = vpop.permute.xlu0 %294  ;;  %v1050_v16 = vsel %vm322_vm12, 1.0, %v1199_v37 }
 0x1ff   :  { %v255_v47 = vrot.slane %v250_v43, %v1274_v29  ;;  %v300_v12 = vrot.slane %v295_v4, %v1274_v29  ;;  %v452_v24 = vrot.slane %v1050_v16, %v1274_v29  ;;  %v486_v31 = vsel %vm43_vm0, %v478_v19, 0.0  ;;  %p1157_p9 = pnand %p1156_p8, %p1150_p5 }
 0x201   :  { %vm319_vm9 = vcmp.eq.f32.partialorder %v255_v47, %v1279_v30  ;;  %vm324_vm14 = vcmp.eq.f32.partialorder %v300_v12, %v1279_v30  ;;  %v480_v42 = vmul.f32 %v1123_v39, %v452_v24 }
 0x202   :  { %v268_v62 = vpop.permute.xlu1 %267  ;;  %v1047_v20 = vsel %vm319_vm9, 1.0, %v1199_v37  ;;  %v313_v32 = vpop.permute.xlu0 %312  ;;  %v1052_v17 = vsel %vm324_vm14, 1.0, %v1199_v37 }
 0x203   :  { %v273_v51 = vrot.slane %v268_v62, %v1274_v29  ;;  %v440_v14 = vrot.slane %v1047_v20, %v1274_v29  ;;  %v318_v45 = vrot.slane %v313_v32, %v1274_v29  ;;  %v490_v60 = vsel %vm43_vm0, %v480_v42, 0.0 }
 0x204   :  { %v460_v25 = vrot.slane %v1052_v17, %v1274_v29 }
 0x205   :  { %vm321_vm11 = vcmp.eq.f32.partialorder %v273_v51, %v1279_v30  ;;  %v477_v3 = vmul.f32 %v1120_v2, %v440_v14  ;;  %vm326_vm1 = vcmp.eq.f32.partialorder %v318_v45, %v1125_v57  ;;  %v1127_v51 = vld [vmem:[#allocation2 + $0x30] sm:$0xff]  ;;  %v574_v2 = vrot.slane %v1468_v34, 2 }
 0x206   :  { %v286_v61 = vpop.permute.xlu1 %285  ;;  %v1049_v13 = vsel %vm321_vm11, 1.0, %v1199_v37  ;;  %v482_v62 = vmul.f32 %v1126_v40, %v460_v25  ;;  %v1054_v47 = vsel %vm326_vm1, 1.0, %v1199_v37  ;;  %v576_v40 = vrot.slane %v1468_v34, 4 }
 0x207   :  { %v291_v15 = vrot.slane %v286_v61, %v1274_v29  ;;  %v448_v8 = vrot.slane %v1049_v13, %v1274_v29  ;;  %v485_v27 = vsel %vm43_vm0, %v477_v3, 0.0  ;;  %v468_v61 = vrot.slane %v1054_v47, %v1274_v29  ;;  %v1128_v13 = vld [vmem:[#allocation2 + $0x38] sm:$0xff] }
 0x208   :  { %v487_v36 = vadd.f32 %v486_v31, %v485_v27  ;;  %v494_v20 = vsel %vm43_vm0, %v482_v62, 0.0  ;;  %v578_v47 = vrot.slane %v1468_v34, 6 }
 0x209   :  { %vm323_vm13 = vcmp.eq.f32.partialorder %v291_v15, %v1279_v30  ;;  %v479_v10 = vmul.f32 %v1122_v1, %v448_v8  ;;  %v484_v14 = vmul.f32 %v1128_v13, %v468_v61 }
 0x20a   :  { %v304_v18 = vpop.permute.xlu1 %303  ;;  %v1051_v11 = vsel %vm323_vm13, 1.0, %v1199_v37 }
 0x20b   :  { %v309_v26 = vrot.slane %v304_v18, %v1274_v29  ;;  %v488_v33 = vsel %vm43_vm0, %v479_v10, 0.0  ;;  %v456_v35 = vrot.slane %v1051_v11, %v1274_v29  ;;  %v498_v58 = vsel %vm43_vm0, %v484_v14, 0.0 }
 0x20c   :  { %v489_v22 = vadd.f32 %v488_v33, %v487_v36  ;;  %v591_v11 = vmul.f32 %v575_v5, %v1425_v52  ;;  %v579_v36 = vrot.slane %v1468_v34, 7 }
 0x20d   :  { %vm325_vm15 = vcmp.eq.f32.partialorder %v309_v26, %v1279_v30  ;;  %v481_v46 = vmul.f32 %v1124_v23, %v456_v35  ;;  %v577_v26 = vrot.slane %v1468_v34, 5 }
 0x20e   :  { %v1053_v53 = vsel %vm325_vm15, 1.0, %v1199_v37  ;;  %v491_v50 = vadd.f32 %v490_v60, %v489_v22  ;;  %v595_v23 = vmul.f32 %v579_v36, %v1433_v59 }
 0x20f   :  { %v492_v30 = vsel %vm43_vm0, %v481_v46, 0.0  ;;  %v464_v43 = vrot.slane %v1053_v53, %v1274_v29  ;;  %v590_v29 = vmul.f32 %v574_v2, %v1423_v48  ;;  %v573_v48 = vrot.slane %v1468_v34, 1 }
 0x210   :  { %v493_v6 = vadd.f32 %v492_v30, %v491_v50  ;;  %v593_v33 = vmul.f32 %v577_v26, %v1427_v55  ;;  %v588_v50 = vmul.f32 %v1468_v34, %v564_v44 }
 0x211   :  { %v483_v0 = vmul.f32 %v1127_v51, %v464_v43  ;;  %v589_v52 = vmul.f32 %v573_v48, %v1429_v56 }
 0x212   :  { %v495_v9 = vadd.f32 %v494_v20, %v493_v6 }
 0x213   :  { %v496_v49 = vsel %vm43_vm0, %v483_v0, 0.0  ;;  %v592_v0 = vmul.f32 %v576_v40, %v1435_v63 }
 0x214   :  { %v497_v15 = vadd.f32 %v496_v49, %v495_v9 }
 0x216   :  { %v499_v8 = vadd.f32 %v498_v58, %v497_v15  ;;  %v594_v15 = vmul.f32 %v578_v47, %v1437_v54 }
 0x218   :  { %v865_v4 = vmul.f32 %v1284_v38, %v499_v8 }
 0x21a   :  { %v866_v37 = vsub.f32 %v1405_v21, %v865_v4 }
 0x21c   :  { %v867_v3 = vmul.f32 %v1468_v34, %v866_v37 }
 0x21e   :  { %v950_v19 = vrot.slane %v867_v3, 2  ;;  %v951_v21 = vrot.slane %v867_v3, 3  ;;  %v953_v32 = vrot.slane %v867_v3, 5  ;;  %v949_v60 = vrot.slane %v867_v3, 1 }
 0x21f   :  { %v955_v55 = vrot.slane %v867_v3, 7  ;;  %v952_v9 = vrot.slane %v867_v3, 4  ;;  %v954_v4 = vrot.slane %v867_v3, 6 }
 0x257   :  { %v884_v16 = vpop.permute.xlu0 %883 }
 0x258   :  { %v911_v18 = vrot.slane %v884_v16, %v1445_v7 }
 0x25a   :  { %v942_v12 = vadd.f32 %v911_v18, %v590_v29 }
 0x25b   :  { %v887_v1 = vpop.permute.xlu0 %886 }
 0x25c   :  { %v966_v10 = vadd.f32 %v950_v19, %v942_v12  ;;  %v915_v38 = vrot.slane %v887_v1, %v1445_v7 }
 0x25e   :  { %v943_v24 = vadd.f32 %v915_v38, %v591_v11  ;;  %v990_v41 = vrot.slane %v966_v10, 6 }
 0x260   :  { %v967_v27 = vadd.f32 %v951_v21, %v943_v24 }
 0x262   :  { %v992_v28 = vrot.slane %v967_v27, 5 }
 0x263   :  { %v893_v31 = vpop.permute.xlu0 %892 }
 0x264   :  { %v923_v35 = vrot.slane %v893_v31, %v1445_v7 }
 0x266   :  { %v945_v39 = vadd.f32 %v923_v35, %v593_v33 }
 0x267   :  { %v881_v42 = vpop.permute.xlu1 %880  ;;  %v899_v17 = vpop.permute.xlu0 %898 }
 0x268   :  { %v969_v22 = vadd.f32 %v953_v32, %v945_v39  ;;  %v907_v45 = vrot.slane %v881_v42, %v1445_v7  ;;  %v931_v46 = vrot.slane %v899_v17, %v1445_v7 }
 0x26a   :  { %v941_v53 = vadd.f32 %v907_v45, %v589_v52  ;;  %v947_v25 = vadd.f32 %v931_v46, %v595_v23  ;;  %v996_v37 = vrot.slane %v969_v22, 3 }
 0x26b   :  { %v878_v57 = vpop.permute.xlu1 %877 }
 0x26c   :  { %v965_v56 = vadd.f32 %v949_v60, %v941_v53  ;;  %v971_v30 = vadd.f32 %v955_v55, %v947_v25  ;;  %v903_v43 = vrot.slane %v878_v57, %v1445_v7 }
 0x26e   :  { %v940_v62 = vadd.f32 %v903_v43, %v588_v50  ;;  %v988_v6 = vrot.slane %v965_v56, 7  ;;  %v1000_v5 = vrot.slane %v971_v30, 1 }
 0x26f   :  { %v890_v59 = vpop.permute.xlu1 %889 }
 0x270   :  { %v964_v51 = vadd.f32 %v940_v62, %v867_v3  ;;  %v919_v20 = vrot.slane %v890_v59, %v1445_v7 }
 0x272   :  { %v989_v44 = vsel %vm532_vm2, %v988_v6, %v964_v51  ;;  %v944_v61 = vadd.f32 %v919_v20, %v592_v0 }
 0x273   :  { %v991_v49 = vsel %vm534_vm3, %v990_v41, %v989_v44  ;;  %v896_v13 = vpop.permute.xlu1 %895 }
 0x274   :  { %v968_v14 = vadd.f32 %v952_v9, %v944_v61  ;;  %v927_v34 = vrot.slane %v896_v13, %v1445_v7  ;;  %v993_v58 = vsel %vm536_vm4, %v992_v28, %v991_v49 }
 0x276   :  { %v994_v8 = vrot.slane %v968_v14, 4  ;;  %v946_v63 = vadd.f32 %v927_v34, %v594_v15 }
 0x278   :  { %v970_v2 = vadd.f32 %v954_v4, %v946_v63  ;;  %v995_v16 = vsel %vm538_vm5, %v994_v8, %v993_v58 }
 0x279   :  { %v997_v29 = vsel %vm540_vm6, %v996_v37, %v995_v16 }
 0x27a   :  { %v998_v18 = vrot.slane %v970_v2, 2 }
 0x27c   :  { %v999_v19 = vsel %vm542_vm7, %v998_v18, %v997_v29 }
 0x27d   :  { %v1001_v12 = vsel %vm544_vm8, %v1000_v5, %v999_v19 }
 0x27e   :  { %v1004_v54 = vsel %vm43_vm0, %v1001_v12, 0.0  ;;  %1003 = vst.msk [vmem:[#allocation6] sm:$0xff] %vm43_vm0, %v1001_v12 }
 0x27f   :  { %1005 = vadd.xlane.f32.xlu1 %v1004_v54 }
 0x280   :  { %1160 = shalt.err (!%p1157_p9)
}
 0x281   :  { %1036 = dma.vmem_to_hbm [thread:$0]  %s1034_s20, 128, %s1620_s5, [#allocation7]   ;;  %vm1015_vm0 = vcmask 0  }
 0x282   :  { %s1201_s24 = smov [#allocation5]  }
 0x283   :  { %s1023_s0 = sshll.u32 %s1201_s24, 4  ;;  %s1024_s0 = int_to_ptr.vmem [resolvable:$true] %s1023_s0 }
 0x284   :  { %s1169_s26 = scalar_lea.vmem %s1024_s0, 16  ;;  %s1173_s27 = scalar_lea.vmem %s1024_s0, 32 }
 0x285   :  { %p1170_p10 = scmp.ne.s32.totalorder %s1024_s0, %s1169_s26  ;;  %p1174_p11 = scmp.lt.s32.totalorder %s1024_s0, %s1024_s0 }
 0x286   :  { %p1175_p12 = scmp.lt.s32.totalorder %s1173_s27, %s1169_s26 }
 0x288   :  { %p1176_p13 = por %p1175_p12, %p1174_p11 }
 0x28a   :  { %p1177_p0 = pnand %p1176_p13, %p1170_p10 }
 0x308   :  { %v1006_v7 = vpop.xlane.xlu1 %1005 }
 0x309   :  { %v1007_v3 = vrot.slane %v1006_v7, 4 }
 0x30b   :  { %v1008_v1 = vadd.f32 %v1007_v3, %v1006_v7 }
 0x30d   :  { %v1009_v10 = vrot.slane %v1008_v1, 2 }
 0x30f   :  { %v1010_v11 = vadd.f32 %v1009_v10, %v1008_v1 }
 0x311   :  { %v1011_v38 = vrot.slane %v1010_v11, 1 }
 0x313   :  { %v1012_v21 = vadd.f32 %v1011_v38, %v1010_v11 }
 0x315   :  { %1057 = vpush %v1012_v21 }
 0x346   :  { %s1058_s25 = spop %1057 }
 0x347   :  { %v1014_v24 = vstv %s1058_s25 }
 0x348   :  { %1016 = vst.msk [vmem:[#allocation5] sm:$0x1] %vm1015_vm0, %v1014_v24 }
 0x349   :  { %1180 = shalt.err (!%p1177_p0)
}
 0x34a   :  { %1026 = dma.vmem_to_hbm [thread:$0]  %s1024_s0, 16, %s1619_s4, [#allocation4]  }
 0x34b   :  { %1191 = dma.done.wait [#allocation4], 16  }
 0x34c   :  { %1192 = vsyncadd [#allocation4], 4294967280 }
 0x34d   :  { %1193 = dma.done.wait [#allocation7], 128  }
 0x34e   :  { %1194 = vsyncadd [#allocation7], 4294967168 }
 0x34f   :  { %1043 = vsyncpa [#allocation3], 1 }
 0x350   :  { %1044 = vsyncpa [#allocation4], 1 }
 0x351   :  { %1045 = vsyncpa [#allocation7], 1 }

</bundles_post_ra>
